<compile_context>
chip_gen: v7x
topology: tpu7x:2x2x1
jax: 0.10.0
libtpu: 0.0.40
codegen_flags: <defaults>
</compile_context>

<pallas_src>
import jax
import jax.numpy as jnp
from jax import lax
from jax.experimental import pallas as pl
from jax.experimental.pallas import tpu as pltpu


def _round_up(x, m):
    return ((x + m - 1) // m) * m


def rnn_forward_kernel(x_ref, w_ih_t_ref, b_rnn_ref, w_hh_t_ref,
                       w_cls_t_ref, b_cls_ref, out_ref, pre_ref):
    """Fused input projection + T-step recurrence + classifier, one invocation.

    x_ref:      (T, Bp, F)   time-major, batch-padded input
    w_ih_t_ref: (F,  Hp)     W_ih^T (zero-padded on H)
    b_rnn_ref:  (1,  Hp)     b_ih + b_hh (zero-padded)
    w_hh_t_ref: (Hp, Hp)     W_hh^T (zero-padded)
    w_cls_t_ref:(Hp, Op)     classifier W^T (zero-padded)
    b_cls_ref:  (1,  Op)     classifier bias (zero-padded)
    out_ref:    (Bp, Op)     lane-dense padded logits from the LAST timestep
    pre_ref:    (T, Bp, Hp)  VMEM scratch for the hoisted input projection
    """
    T, Bp, F = x_ref.shape
    Hp = w_hh_t_ref.shape[0]

    # ---- Fused input projection: ONE dense MXU matmul over all (T*Bp) rows,
    # result stays VMEM-resident (no HBM round trip of `pre`). ---------------
    x_flat = x_ref[...].reshape(T * Bp, F)
    pre_ref[...] = (
        jnp.dot(x_flat, w_ih_t_ref[...], preferred_element_type=jnp.float32)
        + b_rnn_ref[...]
    ).reshape(T, Bp, Hp)

    w_hh_t = w_hh_t_ref[...]            # (Hp, Hp) loaded once, reused per step

    def step(t, h):
        # Serial dependency chain: one MXU push + one EUP tanh per timestep.
        return jnp.tanh(pre_ref[t]
                        + jnp.dot(h, w_hh_t,
                                  preferred_element_type=jnp.float32))

    # Carry is (Bp, Hp) f32 = 8x128 = one vreg; full unroll for T=8 is cheap
    # and gives the LLO scheduler visibility across timesteps.
    h_last = lax.fori_loop(0, T, step, jnp.zeros((Bp, Hp), jnp.float32),
                           unroll=True)

    # ---- Classifier on the last hidden state: lane-dense (Bp, Op) store. ---
    out_ref[...] = (
        jnp.dot(h_last, w_cls_t_ref[...], preferred_element_type=jnp.float32)
        + b_cls_ref[...]
    ).astype(out_ref.dtype)


def square_model_forward(X, params):
    """X: (batch, seq, n_features) float32, batch_first like PyTorch."""
    B, T, F = X.shape
    H = params["w_ih"].shape[0]
    O = params["w_cls"].shape[0]

    # Pad to hardware-friendly shapes: 8 sublanes (batch), 128 lanes (H, O).
    Bp = _round_up(max(B, 8), 8)
    Hp = _round_up(max(H, 128), 128)
    Op = _round_up(max(O, 128), 128)

    # Transpose the SMALL tensor (F=4 per row) to time-major, then zero-pad
    # the batch (sublane) dim.  Padded rows produce garbage h but are sliced
    # off; padded H/O columns stay exactly 0 through the recurrence.
    x_tm = jnp.transpose(X, (1, 0, 2)).astype(jnp.float32)       # (T, B, F)
    x_tm = jnp.pad(x_tm, ((0, 0), (0, Bp - B), (0, 0)))          # (T, Bp, F)

    # Pre-transpose + zero-pad weights once (wrapper-side, one-time XLA ops).
    w_ih_t = jnp.pad(params["w_ih"].T.astype(jnp.float32),
                     ((0, 0), (0, Hp - H)))                      # (F, Hp)
    w_hh_t = jnp.pad(params["w_hh"].T.astype(jnp.float32),
                     ((0, Hp - H), (0, Hp - H)))                 # (Hp, Hp)
    w_cls_t = jnp.pad(params["w_cls"].T.astype(jnp.float32),
                      ((0, Hp - H), (0, Op - O)))                # (Hp, Op)
    b_rnn = jnp.pad((params["b_ih"] + params["b_hh"]).astype(jnp.float32),
                    (0, Hp - H)).reshape(1, Hp)                  # fused biases
    b_cls = jnp.pad(params["b_cls"].astype(jnp.float32),
                    (0, Op - O)).reshape(1, Op)

    out_padded = pl.pallas_call(
        rnn_forward_kernel,
        out_shape=jax.ShapeDtypeStruct((Bp, Op), jnp.float32),
        # No grid: one invocation, everything VMEM-resident (whole-array
        # BlockSpecs).  At realistic T, switch to a time-chunked grid so the
        # X stream pipelines behind compute.
        scratch_shapes=[pltpu.VMEM((T, Bp, Hp), jnp.float32)],
        compiler_params=pltpu.CompilerParams(
            vmem_limit_bytes=32 * 1024 * 1024),
    )(x_tm, w_ih_t, b_rnn, w_hh_t, w_cls_t, b_cls)

    # Slice padding away and match PyTorch's out.view(-1, n_outputs).
    return out_padded[:B, :O].reshape(-1, O)


def init_params(key, n_features, hidden_dim, n_outputs):
    """Deterministic init matching PyTorch param shapes (uniform +/- 1/sqrt(H))."""
    ks = jax.random.split(key, 6)
    bound = 1.0 / jnp.sqrt(jnp.float32(hidden_dim))
    u = lambda k, shape: jax.random.uniform(k, shape, jnp.float32, -bound, bound)
    return {
        "w_ih":  u(ks[0], (hidden_dim, n_features)),
        "w_hh":  u(ks[1], (hidden_dim, hidden_dim)),
        "b_ih":  u(ks[2], (hidden_dim,)),
        "b_hh":  u(ks[3], (hidden_dim,)),
        "w_cls": u(ks[4], (n_outputs, hidden_dim)),
        "b_cls": u(ks[5], (n_outputs,)),
    }


def reference_forward(X, p):
    """Pure-JAX reference of the PyTorch forward (for correctness check)."""
    B, T, F = X.shape
    H = p["w_ih"].shape[0]
    h = jnp.zeros((B, H), jnp.float32)
    for t in range(T):
        h = jnp.tanh(X[:, t] @ p["w_ih"].T + p["b_ih"]
                     + h @ p["w_hh"].T + p["b_hh"])
    return (h @ p["w_cls"].T + p["b_cls"]).reshape(-1, p["w_cls"].shape[0])


if __name__ == "__main__":
    n_features, hidden_dim, n_outputs = 4, 32, 1
    batch, seq = 2, 8

    key = jax.random.PRNGKey(0)
    k_x, k_p = jax.random.split(key)
    X = jax.random.normal(k_x, (batch, seq, n_features), jnp.float32)
    params = init_params(k_p, n_features, hidden_dim, n_outputs)

    out = square_model_forward(X, params)
    out = jax.block_until_ready(out)

    ref = reference_forward(X, params)
    assert out.shape == (batch, n_outputs)
    assert jnp.allclose(out, ref, atol=1e-4, rtol=1e-4), (out, ref)

    print("KERNEL_OK")
</pallas_src>

<mosaic_0001>
module attributes {stable_mosaic.version = 11 : i64} {
  func.func @rnn_forward_kernel(%arg0: memref<8x8x4xf32, #tpu.memory_space<vmem>>, %arg1: memref<4x128xf32, #tpu.memory_space<vmem>>, %arg2: memref<1x128xf32, #tpu.memory_space<vmem>>, %arg3: memref<128x128xf32, #tpu.memory_space<vmem>>, %arg4: memref<128x128xf32, #tpu.memory_space<vmem>>, %arg5: memref<1x128xf32, #tpu.memory_space<vmem>>, %arg6: memref<8x128xf32, #tpu.memory_space<vmem>>, %arg7: memref<8x8x128xf32, #tpu.memory_space<vmem>>) attributes {dimension_semantics = [], scalar_prefetch = 0 : i64, scratch_operands = 1 : i64, tpu.core_type = #tpu.core_type<tc>} {
    %c0 = arith.constant 0 : index
    %c0_0 = arith.constant 0 : index
    %c0_1 = arith.constant 0 : index
    %0 = vector.load %arg0[%c0, %c0_0, %c0_1] : memref<8x8x4xf32, #tpu.memory_space<vmem>>, vector<8x8x4xf32>
    %1 = vector.shape_cast %0 : vector<8x8x4xf32> to vector<64x4xf32>
    %c0_2 = arith.constant 0 : index
    %c0_3 = arith.constant 0 : index
    %2 = vector.load %arg1[%c0_2, %c0_3] : memref<4x128xf32, #tpu.memory_space<vmem>>, vector<4x128xf32>
    %cst = arith.constant dense<0.000000e+00> : vector<64x128xf32>
    %3 = tpu.matmul %1, %2, %cst {dimension_numbers = #tpu.dot_dimension_numbers<[1], [0], [0], [1], [0, 0, 1, 1], [], []>} : vector<64x4xf32>, vector<4x128xf32>, vector<64x128xf32> -> vector<64x128xf32>
    %c0_4 = arith.constant 0 : index
    %c0_5 = arith.constant 0 : index
    %4 = vector.load %arg2[%c0_4, %c0_5] : memref<1x128xf32, #tpu.memory_space<vmem>>, vector<1x128xf32>
    %5 = vector.broadcast %4 : vector<1x128xf32> to vector<64x128xf32>
    %6 = arith.addf %3, %5 : vector<64x128xf32>
    %7 = vector.shape_cast %6 : vector<64x128xf32> to vector<8x8x128xf32>
    %c0_6 = arith.constant 0 : index
    %c0_7 = arith.constant 0 : index
    %c0_8 = arith.constant 0 : index
    %8 = vector.load %arg7[%c0_6, %c0_7, %c0_8] : memref<8x8x128xf32, #tpu.memory_space<vmem>>, vector<8x8x128xf32>
    tpu.vector_store %arg7[%c0_6, %c0_7, %c0_8], %7 {strides = array<i32>} : memref<8x8x128xf32, #tpu.memory_space<vmem>>, vector<8x8x128xf32>,
    %c0_9 = arith.constant 0 : index
    %c0_10 = arith.constant 0 : index
    %9 = vector.load %arg3[%c0_9, %c0_10] : memref<128x128xf32, #tpu.memory_space<vmem>>, vector<128x128xf32>
    %cst_11 = arith.constant 0.000000e+00 : f32
    %10 = vector.broadcast %cst_11 : f32 to vector<8x128xf32>
    %c0_i32 = arith.constant 0 : i32
    %11 = arith.index_cast %c0_i32 : i32 to index
    %c0_12 = arith.constant 0 : index
    %c0_13 = arith.constant 0 : index
    %12 = vector.load %arg7[%11, %c0_12, %c0_13] : memref<8x8x128xf32, #tpu.memory_space<vmem>>, vector<1x8x128xf32>
    %13 = vector.shape_cast %12 : vector<1x8x128xf32> to vector<8x128xf32>
    %cst_14 = arith.constant dense<0.000000e+00> : vector<8x128xf32>
    %14 = tpu.matmul %10, %9, %cst_14 {dimension_numbers = #tpu.dot_dimension_numbers<[1], [0], [0], [1], [0, 0, 1, 1], [], []>} : vector<8x128xf32>, vector<128x128xf32>, vector<8x128xf32> -> vector<8x128xf32>
    %15 = arith.addf %13, %14 : vector<8x128xf32>
    %16 = math.tanh %15 : vector<8x128xf32>
    %c1_i32 = arith.constant 1 : i32
    %17 = arith.index_cast %c1_i32 : i32 to index
    %c0_15 = arith.constant 0 : index
    %c0_16 = arith.constant 0 : index
    %18 = vector.load %arg7[%17, %c0_15, %c0_16] : memref<8x8x128xf32, #tpu.memory_space<vmem>>, vector<1x8x128xf32>
    %19 = vector.shape_cast %18 : vector<1x8x128xf32> to vector<8x128xf32>
    %cst_17 = arith.constant dense<0.000000e+00> : vector<8x128xf32>
    %20 = tpu.matmul %16, %9, %cst_17 {dimension_numbers = #tpu.dot_dimension_numbers<[1], [0], [0], [1], [0, 0, 1, 1], [], []>} : vector<8x128xf32>, vector<128x128xf32>, vector<8x128xf32> -> vector<8x128xf32>
    %21 = arith.addf %19, %20 : vector<8x128xf32>
    %22 = math.tanh %21 : vector<8x128xf32>
    %c2_i32 = arith.constant 2 : i32
    %23 = arith.index_cast %c2_i32 : i32 to index
    %c0_18 = arith.constant 0 : index
    %c0_19 = arith.constant 0 : index
    %24 = vector.load %arg7[%23, %c0_18, %c0_19] : memref<8x8x128xf32, #tpu.memory_space<vmem>>, vector<1x8x128xf32>
    %25 = vector.shape_cast %24 : vector<1x8x128xf32> to vector<8x128xf32>
    %cst_20 = arith.constant dense<0.000000e+00> : vector<8x128xf32>
    %26 = tpu.matmul %22, %9, %cst_20 {dimension_numbers = #tpu.dot_dimension_numbers<[1], [0], [0], [1], [0, 0, 1, 1], [], []>} : vector<8x128xf32>, vector<128x128xf32>, vector<8x128xf32> -> vector<8x128xf32>
    %27 = arith.addf %25, %26 : vector<8x128xf32>
    %28 = math.tanh %27 : vector<8x128xf32>
    %c3_i32 = arith.constant 3 : i32
    %29 = arith.index_cast %c3_i32 : i32 to index
    %c0_21 = arith.constant 0 : index
    %c0_22 = arith.constant 0 : index
    %30 = vector.load %arg7[%29, %c0_21, %c0_22] : memref<8x8x128xf32, #tpu.memory_space<vmem>>, vector<1x8x128xf32>
    %31 = vector.shape_cast %30 : vector<1x8x128xf32> to vector<8x128xf32>
    %cst_23 = arith.constant dense<0.000000e+00> : vector<8x128xf32>
    %32 = tpu.matmul %28, %9, %cst_23 {dimension_numbers = #tpu.dot_dimension_numbers<[1], [0], [0], [1], [0, 0, 1, 1], [], []>} : vector<8x128xf32>, vector<128x128xf32>, vector<8x128xf32> -> vector<8x128xf32>
    %33 = arith.addf %31, %32 : vector<8x128xf32>
    %34 = math.tanh %33 : vector<8x128xf32>
    %c4_i32 = arith.constant 4 : i32
    %35 = arith.index_cast %c4_i32 : i32 to index
    %c0_24 = arith.constant 0 : index
    %c0_25 = arith.constant 0 : index
    %36 = vector.load %arg7[%35, %c0_24, %c0_25] : memref<8x8x128xf32, #tpu.memory_space<vmem>>, vector<1x8x128xf32>
    %37 = vector.shape_cast %36 : vector<1x8x128xf32> to vector<8x128xf32>
    %cst_26 = arith.constant dense<0.000000e+00> : vector<8x128xf32>
    %38 = tpu.matmul %34, %9, %cst_26 {dimension_numbers = #tpu.dot_dimension_numbers<[1], [0], [0], [1], [0, 0, 1, 1], [], []>} : vector<8x128xf32>, vector<128x128xf32>, vector<8x128xf32> -> vector<8x128xf32>
    %39 = arith.addf %37, %38 : vector<8x128xf32>
    %40 = math.tanh %39 : vector<8x128xf32>
    %c5_i32 = arith.constant 5 : i32
    %41 = arith.index_cast %c5_i32 : i32 to index
    %c0_27 = arith.constant 0 : index
    %c0_28 = arith.constant 0 : index
    %42 = vector.load %arg7[%41, %c0_27, %c0_28] : memref<8x8x128xf32, #tpu.memory_space<vmem>>, vector<1x8x128xf32>
    %43 = vector.shape_cast %42 : vector<1x8x128xf32> to vector<8x128xf32>
    %cst_29 = arith.constant dense<0.000000e+00> : vector<8x128xf32>
    %44 = tpu.matmul %40, %9, %cst_29 {dimension_numbers = #tpu.dot_dimension_numbers<[1], [0], [0], [1], [0, 0, 1, 1], [], []>} : vector<8x128xf32>, vector<128x128xf32>, vector<8x128xf32> -> vector<8x128xf32>
    %45 = arith.addf %43, %44 : vector<8x128xf32>
    %46 = math.tanh %45 : vector<8x128xf32>
    %c6_i32 = arith.constant 6 : i32
    %47 = arith.index_cast %c6_i32 : i32 to index
    %c0_30 = arith.constant 0 : index
    %c0_31 = arith.constant 0 : index
    %48 = vector.load %arg7[%47, %c0_30, %c0_31] : memref<8x8x128xf32, #tpu.memory_space<vmem>>, vector<1x8x128xf32>
    %49 = vector.shape_cast %48 : vector<1x8x128xf32> to vector<8x128xf32>
    %cst_32 = arith.constant dense<0.000000e+00> : vector<8x128xf32>
    %50 = tpu.matmul %46, %9, %cst_32 {dimension_numbers = #tpu.dot_dimension_numbers<[1], [0], [0], [1], [0, 0, 1, 1], [], []>} : vector<8x128xf32>, vector<128x128xf32>, vector<8x128xf32> -> vector<8x128xf32>
    %51 = arith.addf %49, %50 : vector<8x128xf32>
    %52 = math.tanh %51 : vector<8x128xf32>
    %c7_i32 = arith.constant 7 : i32
    %53 = arith.index_cast %c7_i32 : i32 to index
    %c0_33 = arith.constant 0 : index
    %c0_34 = arith.constant 0 : index
    %54 = vector.load %arg7[%53, %c0_33, %c0_34] : memref<8x8x128xf32, #tpu.memory_space<vmem>>, vector<1x8x128xf32>
    %55 = vector.shape_cast %54 : vector<1x8x128xf32> to vector<8x128xf32>
    %cst_35 = arith.constant dense<0.000000e+00> : vector<8x128xf32>
    %56 = tpu.matmul %52, %9, %cst_35 {dimension_numbers = #tpu.dot_dimension_numbers<[1], [0], [0], [1], [0, 0, 1, 1], [], []>} : vector<8x128xf32>, vector<128x128xf32>, vector<8x128xf32> -> vector<8x128xf32>
    %57 = arith.addf %55, %56 : vector<8x128xf32>
    %58 = math.tanh %57 : vector<8x128xf32>
    %c8_i32 = arith.constant 8 : i32
    %c0_36 = arith.constant 0 : index
    %c0_37 = arith.constant 0 : index
    %59 = vector.load %arg4[%c0_36, %c0_37] : memref<128x128xf32, #tpu.memory_space<vmem>>, vector<128x128xf32>
    %cst_38 = arith.constant dense<0.000000e+00> : vector<8x128xf32>
    %60 = tpu.matmul %58, %59, %cst_38 {dimension_numbers = #tpu.dot_dimension_numbers<[1], [0], [0], [1], [0, 0, 1, 1], [], []>} : vector<8x128xf32>, vector<128x128xf32>, vector<8x128xf32> -> vector<8x128xf32>
    %c0_39 = arith.constant 0 : index
    %c0_40 = arith.constant 0 : index
    %61 = vector.load %arg5[%c0_39, %c0_40] : memref<1x128xf32, #tpu.memory_space<vmem>>, vector<1x128xf32>
    %62 = vector.broadcast %61 : vector<1x128xf32> to vector<8x128xf32>
    %63 = arith.addf %60, %62 : vector<8x128xf32>
    %c0_41 = arith.constant 0 : index
    %c0_42 = arith.constant 0 : index
    %64 = vector.load %arg6[%c0_41, %c0_42] : memref<8x128xf32, #tpu.memory_space<vmem>>, vector<8x128xf32>
    tpu.vector_store %arg6[%c0_41, %c0_42], %63 {strides = array<i32>} : memref<8x128xf32, #tpu.memory_space<vmem>>, vector<8x128xf32>,
    return
  }
}

</mosaic_0001>

<bundles_post_ra>
// kernel: tpu_custom_call.1
= control target key start
LH: loop header
LB: loop body
LE: loop exit
PB: predicated region body
PF: predicated region fallthrough
CT: control target
= control target key end

     0   :  { %11 = vsyncpa [#allocation4], 0  ;;  %s2054_s0 = inlined_call_operand.vmem [shape: f32[8,8,4], index: 0, kind: input, shape index: {}]   ;;  %s2055_s1 = inlined_call_operand.vmem [shape: f32[4,128], index: 1, kind: input, shape index: {}]   ;;  %s2056_s2 = inlined_call_operand.vmem [shape: f32[1,128], index: 2, kind: input, shape index: {}]   ;;  %s2057_s3 = inlined_call_operand.hbm [shape: f32[128,128], index: 3, kind: input, shape index: {}]   ;;  %s2058_s4 = inlined_call_operand.hbm [shape: f32[128,128], index: 4, kind: input, shape index: {}]   ;;  %s2059_s5 = inlined_call_operand.vmem [shape: f32[1,128], index: 5, kind: input, shape index: {}]   ;;  %s2060_s6 = inlined_call_operand.hbm [shape: f32[8,128], index: 6, kind: output, shape index: {}]  }
   0x1   :  { %12 = vsyncpa [#allocation7], 0 }
   0x2   :  { %13 = vsyncpa [#allocation5], 0  ;;  %s1741_s21 = smov [#allocation3]   ;;  %s1669_s25 = scalar_lea.hbm %s2057_s3, 2048 }
   0x3   :  { %s25_s22 = sshll.u32 %s1741_s21, 4  ;;  %p1670_p0 = scmp.ne.s32.totalorder %s2057_s3, %s1669_s25  ;;  %s26_s22 = int_to_ptr.vmem [resolvable:$true] %s25_s22 }
   0x4   :  { %p1673_p1 = scmp.lt.u32.totalorder %s1669_s25, %s2057_s3 }
   0x6   :  { %p1675_p2 = pnand %p1673_p1, %p1670_p0 }
   0x8   :  { %1678 = shalt.err (!%p1675_p2)
}
   0x9   :  { %s1679_s30 = scalar_lea.vmem %s26_s22, 2048  ;;  %p1684_p4 = scmp.lt.s32.totalorder %s26_s22, %s26_s22 }
   0xa   :  { %p1680_p3 = scmp.ne.s32.totalorder %s26_s22, %s1679_s30  ;;  %p1685_p5 = scmp.lt.s32.totalorder %s1679_s30, %s1679_s30 }
   0xc   :  { %p1686_p6 = por %p1685_p5, %p1684_p4 }
   0xe   :  { %p1687_p7 = pnand %p1686_p6, %p1680_p3 }
  0x10   :  { %1690 = shalt.err (!%p1687_p7)
}
  0x11   :  { %s1742_s7 = smov 128   ;;  %s1743_s8 = smov 8  }
  0x12   :  { %31 = dma.hbm_to_vmem [thread:$0]  %s2057_s3, 2048, %s26_s22, [#allocation4], %s1742_s7, %s1742_s7, %s1743_s8  }
  0x13   :  { %s1744_s11 = smov [#allocation6]   ;;  %s1691_s15 = scalar_lea.hbm %s2058_s4, 2048 }
  0x14   :  { %s37_s12 = sshll.u32 %s1744_s11, 4  ;;  %p1692_p8 = scmp.ne.s32.totalorder %s2058_s4, %s1691_s15  ;;  %s38_s12 = int_to_ptr.vmem [resolvable:$true] %s37_s12 }
  0x15   :  { %p1695_p9 = scmp.lt.u32.totalorder %s1691_s15, %s2058_s4 }
  0x17   :  { %p1697_p10 = pnand %p1695_p9, %p1692_p8 }
  0x19   :  { %1700 = shalt.err (!%p1697_p10)
}
  0x1a   :  { %s1701_s20 = scalar_lea.vmem %s38_s12, 2048  ;;  %p1706_p12 = scmp.lt.s32.totalorder %s38_s12, %s38_s12 }
  0x1b   :  { %p1702_p11 = scmp.ne.s32.totalorder %s38_s12, %s1701_s20  ;;  %p1707_p13 = scmp.lt.s32.totalorder %s1701_s20, %s1701_s20 }
  0x1d   :  { %p1708_p0 = por %p1707_p13, %p1706_p12 }
  0x1f   :  { %p1709_p1 = pnand %p1708_p0, %p1702_p11 }
  0x21   :  { %1712 = shalt.err (!%p1709_p1)
}
  0x22   :  { %43 = dma.hbm_to_vmem [thread:$0]  %s2058_s4, 2048, %s38_s12, [#allocation7], %s1742_s7, %s1742_s7, %s1743_s8  }
  0x23   :  { %1735 = dma.done.wait [#allocation4], 2048  }
  0x24   :  { %1736 = vsyncadd [#allocation4], 4294965248 }
  0x25   :  { %1737 = dma.done.wait [#allocation7], 2048  }
  0x26   :  { %1738 = vsyncadd [#allocation7], 4294965248  ;;  %v1745_v0 = vmov 0.0|0.0   ;;  %vm1746_vm0 = vmmov 0   ;;  %v1747_v1 = vmov 0.0   ;;  %v210_v2 = vld [vmem:[#allocation3] sm:$0xff] }
  0x27   :  { %1429 = vmatprep.subr.bf16.mxu1 %v1745_v0  ;;  %1146 = vmatprep.mubr.msk.f32.mxu1 %vm1746_vm0, %v1747_v1  ;;  %v211_v3 = vld [vmem:[#allocation3 + $0x8] sm:$0xff]  ;;  %v212_v4 = vld [vmem:[#allocation3 + $0x10] sm:$0xff]  ;;  %v213_v6 = vld [vmem:[#allocation3 + $0x18] sm:$0xff]  ;;  %vm93_vm1 = vcmask 1043456   ;;  %vm68_vm2 = vcmask 31744   ;;  %s1748_s16 = smov [#allocation8]  }
  0x28   :  { %v1811_v5 = vpack.c.bf16 %v211_v3, %v210_v2  ;;  %v1814_v7 = vpack.c.bf16 %v213_v6, %v212_v4  ;;  %v214_v8 = vld [vmem:[#allocation3 + $0x20] sm:$0xff]  ;;  %v215_v9 = vld [vmem:[#allocation3 + $0x28] sm:$0xff]  ;;  %v216_v14 = vld [vmem:[#allocation3 + $0x30] sm:$0xff]  ;;  %s917_s17 = sshll.u32 %s1748_s16, 4  ;;  %s918_s17 = int_to_ptr.vmem [resolvable:$true] %s917_s17 }
  0x29   :  { %v60_v10 = vld [vmem:[%s2055_s1] sm:$0xf]  ;;  %v53_v12 = vld [vmem:[%s2054_s0 + $0x8] sm:$0xff]  ;;  %v1828_v13 = vpack.c.bf16 %v215_v9, %v214_v8  ;;  %v217_v15 = vld [vmem:[#allocation3 + $0x38] sm:$0xff]  ;;  %s1713_s18 = scalar_lea.vmem %s918_s17, 128  ;;  %p1718_p3 = scmp.lt.s32.totalorder %s918_s17, %s918_s17 }
  0x2a   :  { %1431 = vmatpush3.bf16.msra.mxu1 %v1811_v5  ;;  %1100 = vmatprep.subr.msk.mxu0 %vm93_vm1, %v60_v10  ;;  %v52_v11 = vld [vmem:[%s2054_s0] sm:$0xff]  ;;  %v1836_v16 = vpack.c.bf16 %v217_v15, %v216_v14  ;;  %v219_v18 = vld [vmem:[#allocation3 + $0x48] sm:$0xff]  ;;  %v220_v20 = vld [vmem:[#allocation3 + $0x50] sm:$0xff]  ;;  %p1714_p2 = scmp.ne.s32.totalorder %s918_s17, %s1713_s18  ;;  %p1719_p4 = scmp.lt.s32.totalorder %s1713_s18, %s1713_s18 }
  0x2b   :  { %1432 = vmatprep.subr.bf16.mxu1 %v1745_v0  ;;  %1101 = vmatpush3.msk.msra.mxu0 %vm93_vm1, %v60_v10  ;;  %v218_v17 = vld [vmem:[#allocation3 + $0x40] sm:$0xff]  ;;  %v221_v21 = vld [vmem:[#allocation3 + $0x58] sm:$0xff]  ;;  %v223_v24 = vld [vmem:[#allocation3 + $0x68] sm:$0xff] }
  0x2c   :  { %1102 = vmatprep.mubr.msk.f32.mxu0 %vm68_vm2, %v52_v11  ;;  %1453 = vmatprep.subr.bf16.mxu0 %v1745_v0  ;;  %v1842_v19 = vpack.c.bf16 %v219_v18, %v218_v17  ;;  %v1848_v22 = vpack.c.bf16 %v221_v21, %v220_v20  ;;  %v222_v23 = vld [vmem:[#allocation3 + $0x60] sm:$0xff]  ;;  %v224_v26 = vld [vmem:[#allocation3 + $0x70] sm:$0xff]  ;;  %v225_v27 = vld [vmem:[#allocation3 + $0x78] sm:$0xff]  ;;  %p1720_p5 = por %p1719_p4, %p1718_p3 }
  0x2d   :  { %1103 = vmatmul.mubr.msk.f32.vlgmr.msra.gmra.mrb[0].mxu0 %vm68_vm2, %v53_v12  ;;  %v1854_v25 = vpack.c.bf16 %v223_v24, %v222_v23  ;;  %v1860_v28 = vpack.c.bf16 %v225_v27, %v224_v26  ;;  %v54_v29 = vld [vmem:[%s2054_s0 + $0x10] sm:$0xff]  ;;  %v55_v30 = vld [vmem:[%s2054_s0 + $0x18] sm:$0xff]  ;;  %v56_v31 = vld [vmem:[%s2054_s0 + $0x20] sm:$0xff] }
  0x2e   :  { %1434 = vmatpush3.bf16.msra.mxu1 %v1814_v7  ;;  %1455 = vmatpush3.bf16.msra.mxu0 %v1811_v5  ;;  %v57_v32 = vld [vmem:[%s2054_s0 + $0x28] sm:$0xff]  ;;  %v58_v33 = vld [vmem:[%s2054_s0 + $0x30] sm:$0xff]  ;;  %v59_v34 = vld [vmem:[%s2054_s0 + $0x38] sm:$0xff]  ;;  %p1721_p6 = pnand %p1720_p5, %p1714_p2 }
  0x2f   :  { %1435 = vmatprep.subr.bf16.mxu1 %v1745_v0  ;;  %1456 = vmatprep.subr.bf16.mxu0 %v1745_v0  ;;  %v1919_v37 = vld [vmem:[%s2056_s2] ss:$0 sm:$0xff]  ;;  %v819_v14 = vld [vmem:[#allocation6 + $0x10] sm:$0xff]  ;;  %v826_v24 = vld [vmem:[#allocation6 + $0x48] sm:$0xff] }
  0x30   :  { %1105 = vmatprep.mubr.msk.f32.mxu0 %vm68_vm2, %v54_v29  ;;  %v817_v12 = vld [vmem:[#allocation6] sm:$0xff]  ;;  %v823_v21 = vld [vmem:[#allocation6 + $0x30] sm:$0xff] }
  0x31   :  { %1106 = vmatmul.mubr.msk.f32.gmra.mrb[2].mxu0 %vm68_vm2, %v55_v30  ;;  %v821_v18 = vld [vmem:[#allocation6 + $0x20] sm:$0xff] }
  0x32   :  { %1437 = vmatpush3.bf16.msra.mxu1 %v1828_v13  ;;  %1458 = vmatpush3.bf16.msra.mxu0 %v1814_v7 }
  0x33   :  { %1438 = vmatprep.subr.bf16.mxu1 %v1745_v0  ;;  %1459 = vmatprep.subr.bf16.mxu0 %v1745_v0 }
  0x34   :  { %1108 = vmatprep.mubr.msk.f32.mxu0 %vm68_vm2, %v56_v31  ;;  %v827_v31 = vld [vmem:[#allocation6 + $0x50] sm:$0xff] }
  0x35   :  { %1109 = vmatmul.mubr.msk.f32.gmra.mrb[4].mxu0 %vm68_vm2, %v57_v32  ;;  %v828_v32 = vld [vmem:[#allocation6 + $0x58] sm:$0xff] }
  0x36   :  { %1440 = vmatpush3.bf16.msra.mxu1 %v1836_v16  ;;  %1461 = vmatpush3.bf16.msra.mxu0 %v1828_v13 }
  0x37   :  { %1441 = vmatprep.subr.bf16.mxu1 %v1745_v0  ;;  %1462 = vmatprep.subr.bf16.mxu0 %v1745_v0 }
  0x38   :  { %1111 = vmatprep.mubr.msk.f32.mxu0 %vm68_vm2, %v58_v33  ;;  %v1637_v33 = vpack.c.bf16 %v828_v32, %v827_v31 }
  0x39   :  { %1112 = vmatmul.mubr.msk.f32.gmra.mrb[6].mxu0 %vm68_vm2, %v59_v34  ;;  %v829_v34 = vld [vmem:[#allocation6 + $0x60] sm:$0xff] }
  0x3a   :  { %1443 = vmatpush3.bf16.msra.mxu1 %v1842_v19  ;;  %1464 = vmatpush3.bf16.msra.mxu0 %v1836_v16 }
  0x3b   :  { %1444 = vmatprep.subr.bf16.mxu1 %v1745_v0  ;;  %1465 = vmatprep.subr.bf16.mxu0 %v1745_v0 }
  0x3c   :  { %1181 = vmatprep.mubr.msk.f32.mxu0 %vm1746_vm0, %v1747_v1 }
  0x3e   :  { %1446 = vmatpush3.bf16.msra.mxu1 %v1848_v22  ;;  %1467 = vmatpush3.bf16.msra.mxu0 %v1842_v19 }
  0x3f   :  { %1447 = vmatprep.subr.bf16.mxu1 %v1745_v0  ;;  %1468 = vmatprep.subr.bf16.mxu0 %v1745_v0 }
  0x42   :  { %1449 = vmatpush3.bf16.msra.mxu1 %v1854_v25  ;;  %1470 = vmatpush3.bf16.msra.mxu0 %v1848_v22 }
  0x43   :  { %1450 = vmatprep.subr.bf16.mxu1 %v1745_v0  ;;  %1471 = vmatprep.subr.bf16.mxu0 %v1745_v0 }
  0x46   :  { %1452 = vmatpush3.bf16.msra.mxu1 %v1860_v28  ;;  %1473 = vmatpush3.bf16.msra.mxu0 %v1854_v25 }
  0x47   :  { %1477 = vmatprep.subr.bf16.mxu1 %v1745_v0  ;;  %1474 = vmatprep.subr.bf16.mxu0 %v1745_v0 }
  0x49   :  { %1147 = vmatmul.mubr.f32.vlgmr.msra.gmra.mrb[0].mxu1 %v1747_v1 }
  0x4a   :  { %1479 = vmatpush3.bf16.msra.mxu1 %v1811_v5  ;;  %1216 = vmatprep.mubr.msk.f32.mxu1 %vm1746_vm0, %v1747_v1 }
  0x4b   :  { %1480 = vmatprep.subr.bf16.mxu1 %v1745_v0  ;;  %1476 = vmatpush3.bf16.msra.mxu0 %v1860_v28 }
  0x4c   :  { %1501 = vmatprep.subr.bf16.mxu0 %v1745_v0 }
  0x4e   :  { %1482 = vmatpush3.bf16.msra.mxu1 %v1814_v7 }
  0x4f   :  { %1483 = vmatprep.subr.bf16.mxu1 %v1745_v0 }
  0x52   :  { %1485 = vmatpush3.bf16.msra.mxu1 %v1828_v13 }
  0x53   :  { %1486 = vmatprep.subr.bf16.mxu1 %v1745_v0 }
  0x56   :  { %1488 = vmatpush3.bf16.msra.mxu1 %v1836_v16 }
  0x57   :  { %1489 = vmatprep.subr.bf16.mxu1 %v1745_v0 }
  0x5a   :  { %1491 = vmatpush3.bf16.msra.mxu1 %v1842_v19 }
  0x5b   :  { %1492 = vmatprep.subr.bf16.mxu1 %v1745_v0 }
  0x5e   :  { %1494 = vmatpush3.bf16.msra.mxu1 %v1848_v22 }
  0x5f   :  { %1495 = vmatprep.subr.bf16.mxu1 %v1745_v0 }
  0x62   :  { %1497 = vmatpush3.bf16.msra.mxu1 %v1854_v25 }
  0x63   :  { %1498 = vmatprep.subr.bf16.mxu1 %v1745_v0 }
  0x66   :  { %1500 = vmatpush3.bf16.msra.mxu1 %v1860_v28 }
  0x67   :  { %1525 = vmatprep.subr.bf16.mxu1 %v1745_v0 }
 0x100   :  { %v1104_v35 = vpop.f32.mrb[0].mxu0 }
 0x101   :  { %v163_v36 = vpop.f32.mrb[1].mxu0  ;;  %v169_v49 = vadd.f32 %v1104_v35, %v1919_v37  ;;  %v830_v35 = vld [vmem:[#allocation6 + $0x68] sm:$0xff] }
 0x102   :  { %v164_v38 = vadd.f32 %v1919_v37, %v163_v36  ;;  %v1640_v36 = vpack.c.bf16 %v830_v35, %v829_v34 }
 0x104   :  { %v1107_v43 = vpop.f32.mrb[2].mxu0 }
 0x105   :  { %v173_v44 = vpop.f32.mrb[3].mxu0  ;;  %v179_v59 = vadd.f32 %v1107_v43, %v1919_v37 }
 0x106   :  { %v174_v54 = vadd.f32 %v1919_v37, %v173_v44 }
 0x108   :  { %v1940_v45 = vpop.f32.mrb[4].mxu0 }
 0x109   :  { %v1942_v46 = vpop.f32.mrb[5].mxu0 }
 0x10a   :  { %v184_v2 = vadd.f32 %v1919_v37, %v1942_v46  ;;  %v937_v46 = vld [vmem:[%s2059_s5] ss:$0 sm:$0xff] }
 0x10c   :  { %v1944_v47 = vpop.f32.mrb[6].mxu0 }
 0x10d   :  { %v1946_v48 = vpop.f32.mrb[7].mxu0 }
 0x10e   :  { %v194_v26 = vadd.f32 %v1919_v37, %v1946_v48 }
 0x11c   :  { %v293_v39 = vpop.f32.mrb[0].mxu1 }
 0x11d   :  { %v297_v40 = vadd.f32 %v293_v39, %v164_v38  ;;  %v1148_v41 = vpop.f32.mrb[1].mxu1  ;;  %v831_v38 = vld [vmem:[#allocation6 + $0x70] sm:$0xff]  ;;  %v832_v39 = vld [vmem:[#allocation6 + $0x78] sm:$0xff] }
 0x11e   :  { %v199_v41 = vadd.f32 %v1944_v47, %v1919_v37 }
 0x11f   :  { %1653 = vtanh.f32 %v297_v40  ;;  %v1643_v40 = vpack.c.bf16 %v832_v39, %v831_v38 }
 0x129   :  { %v1654_v42 = vpop.eup %1653 }
 0x12a   :  { %1182 = vmatmul.mubr.f32.vlgmr.msra.gmra.mrb[8].mxu0 %v1654_v42 }
 0x12b   :  { %1503 = vmatpush3.bf16.msra.mxu0 %v1811_v5  ;;  %1251 = vmatprep.mubr.msk.f32.mxu0 %vm1746_vm0, %v1747_v1 }
 0x12c   :  { %1504 = vmatprep.subr.bf16.mxu0 %v1745_v0 }
 0x12f   :  { %1506 = vmatpush3.bf16.msra.mxu0 %v1814_v7 }
 0x130   :  { %1507 = vmatprep.subr.bf16.mxu0 %v1745_v0 }
 0x133   :  { %1509 = vmatpush3.bf16.msra.mxu0 %v1828_v13 }
 0x134   :  { %1510 = vmatprep.subr.bf16.mxu0 %v1745_v0 }
 0x137   :  { %1512 = vmatpush3.bf16.msra.mxu0 %v1836_v16 }
 0x138   :  { %1513 = vmatprep.subr.bf16.mxu0 %v1745_v0 }
 0x13b   :  { %1515 = vmatpush3.bf16.msra.mxu0 %v1842_v19 }
 0x13c   :  { %1516 = vmatprep.subr.bf16.mxu0 %v1745_v0 }
 0x13f   :  { %1518 = vmatpush3.bf16.msra.mxu0 %v1848_v22 }
 0x140   :  { %1519 = vmatprep.subr.bf16.mxu0 %v1745_v0 }
 0x143   :  { %1521 = vmatpush3.bf16.msra.mxu0 %v1854_v25 }
 0x144   :  { %1522 = vmatprep.subr.bf16.mxu0 %v1745_v0 }
 0x147   :  { %1524 = vmatpush3.bf16.msra.mxu0 %v1860_v28 }
 0x148   :  { %1549 = vmatprep.subr.bf16.mxu0 %v1745_v0 }
 0x1fd   :  { %v367_v50 = vpop.f32.mrb[8].mxu0 }
 0x1fe   :  { %v371_v51 = vadd.f32 %v367_v50, %v169_v49  ;;  %v1183_v52 = vpop.f32.mrb[9].mxu0 }
 0x200   :  { %1655 = vtanh.f32 %v371_v51 }
 0x20a   :  { %v1656_v53 = vpop.eup %1655 }
 0x20b   :  { %1217 = vmatmul.mubr.f32.vlgmr.msra.gmra.mrb[2].mxu1 %v1656_v53 }
 0x20c   :  { %1527 = vmatpush3.bf16.msra.mxu1 %v1811_v5  ;;  %1286 = vmatprep.mubr.msk.f32.mxu1 %vm1746_vm0, %v1747_v1 }
 0x20d   :  { %1528 = vmatprep.subr.bf16.mxu1 %v1745_v0 }
 0x210   :  { %1530 = vmatpush3.bf16.msra.mxu1 %v1814_v7 }
 0x211   :  { %1531 = vmatprep.subr.bf16.mxu1 %v1745_v0 }
 0x214   :  { %1533 = vmatpush3.bf16.msra.mxu1 %v1828_v13 }
 0x215   :  { %1534 = vmatprep.subr.bf16.mxu1 %v1745_v0 }
 0x218   :  { %1536 = vmatpush3.bf16.msra.mxu1 %v1836_v16 }
 0x219   :  { %1537 = vmatprep.subr.bf16.mxu1 %v1745_v0 }
 0x21c   :  { %1539 = vmatpush3.bf16.msra.mxu1 %v1842_v19 }
 0x21d   :  { %1540 = vmatprep.subr.bf16.mxu1 %v1745_v0 }
 0x220   :  { %1542 = vmatpush3.bf16.msra.mxu1 %v1848_v22 }
 0x221   :  { %1543 = vmatprep.subr.bf16.mxu1 %v1745_v0 }
 0x224   :  { %1545 = vmatpush3.bf16.msra.mxu1 %v1854_v25 }
 0x225   :  { %1546 = vmatprep.subr.bf16.mxu1 %v1745_v0 }
 0x228   :  { %1548 = vmatpush3.bf16.msra.mxu1 %v1860_v28 }
 0x229   :  { %1573 = vmatprep.subr.bf16.mxu1 %v1745_v0 }
 0x2de   :  { %v441_v55 = vpop.f32.mrb[2].mxu1 }
 0x2df   :  { %v445_v56 = vadd.f32 %v441_v55, %v174_v54  ;;  %v1218_v57 = vpop.f32.mrb[3].mxu1 }
 0x2e1   :  { %1657 = vtanh.f32 %v445_v56 }
 0x2eb   :  { %v1658_v58 = vpop.eup %1657 }
 0x2ec   :  { %1252 = vmatmul.mubr.f32.vlgmr.msra.gmra.mrb[10].mxu0 %v1658_v58 }
 0x2ed   :  { %1551 = vmatpush3.bf16.msra.mxu0 %v1811_v5  ;;  %1321 = vmatprep.mubr.msk.f32.mxu0 %vm1746_vm0, %v1747_v1 }
 0x2ee   :  { %1552 = vmatprep.subr.bf16.mxu0 %v1745_v0 }
 0x2f1   :  { %1554 = vmatpush3.bf16.msra.mxu0 %v1814_v7 }
 0x2f2   :  { %1555 = vmatprep.subr.bf16.mxu0 %v1745_v0 }
 0x2f5   :  { %1557 = vmatpush3.bf16.msra.mxu0 %v1828_v13 }
 0x2f6   :  { %1558 = vmatprep.subr.bf16.mxu0 %v1745_v0 }
 0x2f9   :  { %1560 = vmatpush3.bf16.msra.mxu0 %v1836_v16 }
 0x2fa   :  { %1561 = vmatprep.subr.bf16.mxu0 %v1745_v0 }
 0x2fd   :  { %1563 = vmatpush3.bf16.msra.mxu0 %v1842_v19 }
 0x2fe   :  { %1564 = vmatprep.subr.bf16.mxu0 %v1745_v0 }
 0x301   :  { %1566 = vmatpush3.bf16.msra.mxu0 %v1848_v22 }
 0x302   :  { %1567 = vmatprep.subr.bf16.mxu0 %v1745_v0 }
 0x305   :  { %1569 = vmatpush3.bf16.msra.mxu0 %v1854_v25 }
 0x306   :  { %1570 = vmatprep.subr.bf16.mxu0 %v1745_v0 }
 0x309   :  { %1572 = vmatpush3.bf16.msra.mxu0 %v1860_v28 }
 0x30a   :  { %1597 = vmatprep.subr.bf16.mxu0 %v1745_v0 }
 0x3bf   :  { %v515_v60 = vpop.f32.mrb[10].mxu0 }
 0x3c0   :  { %v519_v61 = vadd.f32 %v515_v60, %v179_v59  ;;  %v1253_v62 = vpop.f32.mrb[11].mxu0 }
 0x3c2   :  { %1659 = vtanh.f32 %v519_v61 }
 0x3cc   :  { %v1660_v63 = vpop.eup %1659 }
 0x3cd   :  { %1287 = vmatmul.mubr.f32.vlgmr.msra.gmra.mrb[4].mxu1 %v1660_v63 }
 0x3ce   :  { %1575 = vmatpush3.bf16.msra.mxu1 %v1811_v5  ;;  %1356 = vmatprep.mubr.msk.f32.mxu1 %vm1746_vm0, %v1747_v1 }
 0x3cf   :  { %1576 = vmatprep.subr.bf16.mxu1 %v1745_v0 }
 0x3d2   :  { %1578 = vmatpush3.bf16.msra.mxu1 %v1814_v7 }
 0x3d3   :  { %1579 = vmatprep.subr.bf16.mxu1 %v1745_v0 }
 0x3d6   :  { %1581 = vmatpush3.bf16.msra.mxu1 %v1828_v13 }
 0x3d7   :  { %1582 = vmatprep.subr.bf16.mxu1 %v1745_v0 }
 0x3da   :  { %1584 = vmatpush3.bf16.msra.mxu1 %v1836_v16 }
 0x3db   :  { %1585 = vmatprep.subr.bf16.mxu1 %v1745_v0 }
 0x3de   :  { %1587 = vmatpush3.bf16.msra.mxu1 %v1842_v19 }
 0x3df   :  { %1588 = vmatprep.subr.bf16.mxu1 %v1745_v0 }
 0x3e2   :  { %1590 = vmatpush3.bf16.msra.mxu1 %v1848_v22 }
 0x3e3   :  { %1591 = vmatprep.subr.bf16.mxu1 %v1745_v0 }
 0x3e6   :  { %1593 = vmatpush3.bf16.msra.mxu1 %v1854_v25 }
 0x3e7   :  { %1594 = vmatprep.subr.bf16.mxu1 %v1745_v0 }
 0x3ea   :  { %1596 = vmatpush3.bf16.msra.mxu1 %v1860_v28 }
 0x3eb   :  { %1621 = vmatprep.subr.bf16.mxu1 %v1745_v0 }
 0x4a0   :  { %v589_v3 = vpop.f32.mrb[4].mxu1 }
 0x4a1   :  { %v593_v4 = vadd.f32 %v589_v3, %v184_v2  ;;  %v1288_v6 = vpop.f32.mrb[5].mxu1 }
 0x4a3   :  { %1661 = vtanh.f32 %v593_v4 }
 0x4ad   :  { %v1662_v8 = vpop.eup %1661 }
 0x4ae   :  { %1322 = vmatmul.mubr.f32.vlgmr.msra.gmra.mrb[12].mxu0 %v1662_v8 }
 0x4af   :  { %1599 = vmatpush3.bf16.msra.mxu0 %v1811_v5  ;;  %1391 = vmatprep.mubr.msk.f32.mxu0 %vm1746_vm0, %v1747_v1  ;;  %v189_v5 = vadd.f32 %v1940_v45, %v1919_v37 }
 0x4b0   :  { %1600 = vmatprep.subr.bf16.mxu0 %v1745_v0 }
 0x4b3   :  { %1602 = vmatpush3.bf16.msra.mxu0 %v1814_v7 }
 0x4b4   :  { %1603 = vmatprep.subr.bf16.mxu0 %v1745_v0 }
 0x4b7   :  { %1605 = vmatpush3.bf16.msra.mxu0 %v1828_v13  ;;  %v818_v13 = vld [vmem:[#allocation6 + $0x8] sm:$0xff] }
 0x4b8   :  { %1606 = vmatprep.subr.bf16.mxu0 %v1745_v0  ;;  %v1622_v15 = vpack.c.bf16 %v818_v13, %v817_v12 }
 0x4bb   :  { %1608 = vmatpush3.bf16.msra.mxu0 %v1836_v16  ;;  %v820_v16 = vld [vmem:[#allocation6 + $0x18] sm:$0xff] }
 0x4bc   :  { %1609 = vmatprep.subr.bf16.mxu0 %v1745_v0  ;;  %v1625_v17 = vpack.c.bf16 %v820_v16, %v819_v14 }
 0x4bf   :  { %1611 = vmatpush3.bf16.msra.mxu0 %v1842_v19  ;;  %v822_v19 = vld [vmem:[#allocation6 + $0x28] sm:$0xff] }
 0x4c0   :  { %1612 = vmatprep.subr.bf16.mxu0 %v1745_v0  ;;  %v1628_v20 = vpack.c.bf16 %v822_v19, %v821_v18 }
 0x4c3   :  { %1614 = vmatpush3.bf16.msra.mxu0 %v1848_v22  ;;  %v824_v22 = vld [vmem:[#allocation6 + $0x38] sm:$0xff] }
 0x4c4   :  { %1615 = vmatprep.subr.bf16.mxu0 %v1745_v0  ;;  %v1631_v23 = vpack.c.bf16 %v824_v22, %v823_v21 }
 0x4c7   :  { %1617 = vmatpush3.bf16.msra.mxu0 %v1854_v25 }
 0x4c8   :  { %1618 = vmatprep.subr.bf16.mxu0 %v1745_v0 }
 0x4cb   :  { %1620 = vmatpush3.bf16.msra.mxu0 %v1860_v28 }
 0x581   :  { %v663_v7 = vpop.f32.mrb[12].mxu0 }
 0x582   :  { %v667_v9 = vadd.f32 %v663_v7, %v189_v5  ;;  %v1323_v10 = vpop.f32.mrb[13].mxu0 }
 0x584   :  { %1663 = vtanh.f32 %v667_v9 }
 0x58e   :  { %v1664_v11 = vpop.eup %1663 }
 0x58f   :  { %1357 = vmatmul.mubr.f32.vlgmr.msra.gmra.mrb[6].mxu1 %v1664_v11 }
 0x590   :  { %1426 = vmatprep.mubr.msk.f32.mxu1 %vm1746_vm0, %v1747_v1  ;;  %1623 = vmatpush3.bf16.msra.mxu1 %v1622_v15  ;;  %v825_v1 = vld [vmem:[#allocation6 + $0x40] sm:$0xff] }
 0x591   :  { %1624 = vmatprep.subr.bf16.mxu1 %v1745_v0  ;;  %v1634_v25 = vpack.c.bf16 %v826_v24, %v825_v1 }
 0x594   :  { %1626 = vmatpush3.bf16.msra.mxu1 %v1625_v17 }
 0x595   :  { %1627 = vmatprep.subr.bf16.mxu1 %v1745_v0 }
 0x598   :  { %1629 = vmatpush3.bf16.msra.mxu1 %v1628_v20 }
 0x599   :  { %1630 = vmatprep.subr.bf16.mxu1 %v1745_v0 }
 0x59c   :  { %1632 = vmatpush3.bf16.msra.mxu1 %v1631_v23 }
 0x59d   :  { %1633 = vmatprep.subr.bf16.mxu1 %v1745_v0 }
 0x5a0   :  { %1635 = vmatpush3.bf16.msra.mxu1 %v1634_v25 }
 0x5a1   :  { %1636 = vmatprep.subr.bf16.mxu1 %v1745_v0 }
 0x5a4   :  { %1638 = vmatpush3.bf16.msra.mxu1 %v1637_v33 }
 0x5a5   :  { %1639 = vmatprep.subr.bf16.mxu1 %v1745_v0 }
 0x5a8   :  { %1641 = vmatpush3.bf16.msra.mxu1 %v1640_v36 }
 0x5a9   :  { %1642 = vmatprep.subr.bf16.mxu1 %v1745_v0 }
 0x5ac   :  { %1644 = vmatpush3.bf16.msra.mxu1 %v1643_v40 }
 0x662   :  { %v737_v27 = vpop.f32.mrb[6].mxu1 }
 0x663   :  { %v741_v28 = vadd.f32 %v737_v27, %v194_v26  ;;  %v1358_v29 = vpop.f32.mrb[7].mxu1 }
 0x665   :  { %1665 = vtanh.f32 %v741_v28 }
 0x66f   :  { %v1666_v30 = vpop.eup %1665 }
 0x670   :  { %1392 = vmatmul.mubr.f32.vlgmr.msra.gmra.mrb[14].mxu0 %v1666_v30 }
 0x743   :  { %v811_v42 = vpop.f32.mrb[14].mxu0 }
 0x744   :  { %v815_v43 = vadd.f32 %v811_v42, %v199_v41  ;;  %v1393_v44 = vpop.f32.mrb[15].mxu0 }
 0x746   :  { %1667 = vtanh.f32 %v815_v43 }
 0x750   :  { %v1668_v45 = vpop.eup %1667 }
 0x751   :  { %1427 = vmatmul.mubr.f32.vlgmr.msra.gmra.mrb[8].mxu1 %v1668_v45 }
 0x824   :  { %v906_v48 = vpop.f32.mrb[8].mxu1 }
 0x825   :  { %v907_v49 = vadd.f32 %v937_v46, %v906_v48  ;;  %v1428_v50 = vpop.f32.mrb[9].mxu1 }
 0x827   :  { %910 = vst [vmem:[#allocation8] sm:$0xff] %v907_v49 }
 0x828   :  { %1724 = shalt.err (!%p1721_p6)
}
 0x829   :  { %s1725_s3 = scalar_lea.hbm %s2060_s6, 128 }
 0x82a   :  { %p1726_p7 = scmp.ne.s32.totalorder %s2060_s6, %s1725_s3  ;;  %p1729_p8 = scmp.lt.u32.totalorder %s1725_s3, %s2060_s6 }
 0x82c   :  { %p1731_p9 = pnand %p1729_p8, %p1726_p7 }
 0x82e   :  { %1734 = shalt.err (!%p1731_p9)
}
 0x82f   :  { %920 = dma.vmem_to_hbm [thread:$0]  %s918_s17, 128, %s2060_s6, [#allocation5]  }
 0x830   :  { %1739 = dma.done.wait [#allocation5], 128  }
 0x831   :  { %1740 = vsyncadd [#allocation5], 4294967168 }
 0x832   :  { %924 = vsyncpa [#allocation4], 1 }
 0x833   :  { %925 = vsyncpa [#allocation7], 1 }
 0x834   :  { %926 = vsyncpa [#allocation5], 1 }

</bundles_post_ra>
